<compile_context>
chip_gen: v6e
topology: v6e:2x2x1
jax: 0.10.0
libtpu: 0.0.40
codegen_flags: <defaults>
</compile_context>

<pallas_src>
import functools

import jax
import jax.numpy as jnp
from jax.experimental import pallas as pl
from jax.experimental.pallas import tpu as pltpu

DROPOUT_RATE = 0.2


def _round_up(x: int, m: int) -> int:
    return (x + m - 1) // m * m


def _cdiv(a: int, b: int) -> int:
    return (a + b - 1) // b


def _i32(u: int):
    """Wrap a uint32 constant into an int32 constant (two's complement)."""
    u &= 0xFFFFFFFF
    if u >= 0x80000000:
        u -= 0x100000000
    return jnp.int32(u)


def _splitmix32(x):
    """splitmix32 finalizer over int32 (wrapping int32 == uint32 bit-identical).

    Only iota/mul/xor/logical-shift -> lowers on Mosaic TPU and in interpret
    mode alike; stateless, so safe under "parallel" grid semantics.
    """
    x = jax.lax.bitwise_xor(x, jax.lax.shift_right_logical(x, jnp.int32(16)))
    x = x * _i32(0x7FEB352D)
    x = jax.lax.bitwise_xor(x, jax.lax.shift_right_logical(x, jnp.int32(15)))
    x = x * _i32(0x846CA68B)
    x = jax.lax.bitwise_xor(x, jax.lax.shift_right_logical(x, jnp.int32(16)))
    return x


def _encoder_kernel(seed_ref, x_ref, w1_ref, b1_ref, w2_ref, b2_ref, o_ref,
                    *scratch, training: bool, dropout_rate: float,
                    input_size: int, k_tile: int, num_k: int):
    """relu(x @ W1 + b1) -> dropout -> relu(. @ W2 + b2) -> dropout.

    Grid is (batch_tiles, k_tiles); the first matmul is optionally streamed
    over the K axis (axis 1) into an f32 VMEM accumulator scratch.
    """
    acc_ref = scratch[0] if scratch else None
    k = pl.program_id(1)

    x_blk = x_ref[...]
    w1_blk = w1_ref[...]
    if num_k > 1 and input_size % k_tile != 0:
        # Ragged last K block: zero the out-of-range columns/rows so the
        # undefined block-padding data cannot contribute to the accumulation.
        limit = input_size - k * k_tile
        col = jax.lax.broadcasted_iota(jnp.int32, x_blk.shape, 1)
        x_blk = jnp.where(col < limit, x_blk, jnp.zeros_like(x_blk))
        row = jax.lax.broadcasted_iota(jnp.int32, w1_blk.shape, 0)
        w1_blk = jnp.where(row < limit, w1_blk, jnp.zeros_like(w1_blk))

    # x arrives f32; cast to the MXU compute dtype here (single HBM pass on x).
    part = jnp.dot(x_blk.astype(w1_blk.dtype), w1_blk,
                   preferred_element_type=jnp.float32)

    def finalize(h32):
        h = jnp.maximum(h32 + b1_ref[...], 0.0)

        if training and dropout_rate > 0.0:
            keep = 1.0 - dropout_rate
            inv_keep = jnp.float32(1.0 / keep)
            # signed-int32 threshold: P(bits < thresh) == keep (bias ~2e-10).
            thresh = jnp.int32(min(int(round(keep * (1 << 32))) - (1 << 31),
                                   (1 << 31) - 1))
            # Shared per-element counter (hoisted once for both layers); only
            # the 5-op splitmix finalizer is evaluated per draw.
            rows = jax.lax.broadcasted_iota(jnp.int32, h.shape, 0)
            cols = jax.lax.broadcasted_iota(jnp.int32, h.shape, 1)
            ctr = (rows * _i32(0x9E3779B9) + cols * _i32(0x85EBCA6B)
                   + seed_ref[0] * _i32(0x9E3779B1)
                   + (pl.program_id(0) + 1) * _i32(0x85EBCA77))
            bits1 = _splitmix32(ctr + _i32(0x1B873593))
            h = jnp.where(bits1 < thresh, h * inv_keep, 0.0)

        z = jnp.dot(h.astype(w2_ref.dtype), w2_ref[...],
                    preferred_element_type=jnp.float32)
        z = jnp.maximum(z + b2_ref[...], 0.0)

        if training and dropout_rate > 0.0:
            # Drawn right before use (NOT hoisted above the second matmul) to
            # avoid an extra live int32 tile across the dot.
            bits2 = _splitmix32(ctr + _i32(0x27220A95))
            z = jnp.where(bits2 < thresh, z * inv_keep, 0.0)

        o_ref[...] = z.astype(o_ref.dtype)

    if num_k == 1:
        # W1 fully resident: no accumulator round-trip through VMEM scratch.
        finalize(part)
    else:
        @pl.when(k == 0)
        def _():
            acc_ref[...] = jnp.zeros_like(acc_ref)

        acc_ref[...] += part

        @pl.when(k == num_k - 1)
        def _():
            finalize(acc_ref[...])


def nonlinear_encoder_forward(data, params, *, training: bool = False,
                              dropout_seed: int = 0, batch_tile: int = 1024,
                              compute_dtype=jnp.bfloat16,
                              out_dtype=jnp.float32, k_tile=None,
                              return_padded: bool = False):
    """JAX wrapper reproducing Nonlinear_encoder.forward (dr=True branch).

    data:          any shape; flattened to (-1, input_size) like `.float().view(...)`.
    params:        dict with w1 (in, hid), b1 (hid,), w2 (hid, hid), b2 (hid,).
    training:      False -> eval-mode dropout (identity), deterministic.
    compute_dtype: MXU input dtype (bf16 default; accumulation is always f32).
    out_dtype:     output dtype (f32 default; bf16 halves writeback traffic).
    k_tile:        force the K (input_size) block size (multiple of 128 or
                   >= input_size); None -> auto.
    return_padded: return the lane-padded (batch, round_up(n_latent,128)) array
                   and skip the trailing slice copy.
    """
    f32 = jnp.float32
    input_size, n_latent = params["w1"].shape

    # `.float().view(-1, input_size)`: x stays f32 in HBM; the bf16 cast for
    # the MXU happens inside the kernel (no separate host-side convert pass).
    x = jnp.asarray(data, f32).reshape(-1, input_size)
    batch = x.shape[0]

    # Lane-pad hidden/output feature dim to a multiple of 128 so stores are
    # full-lane and the MXU result width is filled; pad cols/rows are zeros so
    # the math is unchanged; sliced off on return (unless return_padded).
    n_pad = _round_up(n_latent, 128)
    dpad = n_pad - n_latent
    w1, b1, w2, b2 = params["w1"], params["b1"], params["w2"], params["b2"]
    if dpad:
        w1 = jnp.pad(w1, ((0, 0), (0, dpad)))
        w2 = jnp.pad(w2, ((0, dpad), (0, dpad)))
        b1 = jnp.pad(b1, (0, dpad))
        b2 = jnp.pad(b2, (0, dpad))
    w1 = w1.astype(compute_dtype)
    w2 = w2.astype(compute_dtype)
    b1 = b1.reshape(1, n_pad).astype(f32)
    b2 = b2.reshape(1, n_pad).astype(f32)

    # ---- generation-aware VMEM budget (v7x: 64 MiB/TC, v5e/v6e: 128 MiB) ----
    try:
        vmem_phys = pltpu.get_tpu_info().vmem_capacity_bytes
    except Exception:
        vmem_phys = 64 * 1024 * 1024        # conservative fallback (v7x size)
    vmem_limit = (vmem_phys * 3) // 4        # ~48 MiB on v7x, ~96 MiB on v5e/v6e
    budget = int(vmem_limit * 0.85)          # headroom for Mosaic internal scratch

    x_bytes = 4
    w_bytes = jnp.dtype(compute_dtype).itemsize
    o_bytes = jnp.dtype(out_dtype).itemsize
    fixed = n_pad * n_pad * w_bytes + 2 * n_pad * 4   # resident W2 + b1 + b2

    def max_tb(tk, w1_bufs):
        # Full accounting: x tile (2 bufs, f32), out tile (2 bufs), W1 (1 or 2
        # bufs), f32 accumulator scratch, ~5 f32/i32 intermediates per element.
        avail = budget - fixed - w1_bufs * tk * n_pad * w_bytes
        per_row = (2 * tk * x_bytes + 2 * n_pad * o_bytes
                   + n_pad * 4 + 5 * n_pad * 4)
        return max(0, avail) // per_row

    target_tb = max(8, min(batch_tile, _round_up(batch, 16)))

    if k_tile is not None:
        tk = input_size if k_tile >= input_size else int(k_tile)
        if tk != input_size and tk % 128 != 0:
            raise ValueError("k_tile must be a multiple of 128 or >= input_size")
    else:
        tk = input_size
        if input_size > 2048 and max_tb(input_size, 1) < min(target_tb, 128):
            # W1 cannot stay resident next to a sensible batch tile: stream it
            # over a K grid axis in the largest lane-aligned block that fits.
            tk = 2048
            while tk > 128 and max_tb(tk, 2) < min(target_tb, 128):
                tk //= 2
    num_k = _cdiv(input_size, tk)
    w1_bufs = 1 if num_k == 1 else 2

    # TODO(synk): if even tb=8 over-runs the VMEM budget (pathologically large
    # n_latent), W2/n_pad would also need tiling; not needed for this model.
    tb = min(target_tb, max(8, max_tb(tk, w1_bufs)))
    if tb >= 16:
        tb = tb // 16 * 16                       # packed-sublane friendly
    tb = max(8, min(tb, _round_up(batch, 8)))    # never exceed (padded) batch
    grid = (_cdiv(batch, tb), num_k)

    seed = jnp.array([dropout_seed], dtype=jnp.int32)
    kernel = functools.partial(_encoder_kernel, training=training,
                               dropout_rate=DROPOUT_RATE,
                               input_size=input_size, k_tile=tk, num_k=num_k)

    resident = {"pipeline_mode": pl.Buffered(1)}   # single-buffer constant blocks
    w1_mode = resident if w1_bufs == 1 else {}     # stream W1 (default 2-deep) else

    cost = pl.CostEstimate(
        flops=2 * batch * (input_size + n_pad) * n_pad,
        transcendentals=0,
        bytes_accessed=(batch * input_size * x_bytes            # x (f32, once)
                        + (input_size + n_pad) * n_pad * w_bytes  # W1, W2
                        + 2 * n_pad * 4                          # b1, b2
                        + batch * n_pad * o_bytes))              # out

    out = pl.pallas_call(
        kernel,
        out_shape=jax.ShapeDtypeStruct((batch, n_pad), out_dtype),
        grid_spec=pltpu.PrefetchScalarGridSpec(
            num_scalar_prefetch=1,                       # dropout seed in SMEM
            grid=grid,
            in_specs=[
                pl.BlockSpec((tb, tk), lambda i, k, s: (i, k)),              # x
                pl.BlockSpec((tk, n_pad), lambda i, k, s: (k, 0), **w1_mode),   # W1
                pl.BlockSpec((1, n_pad), lambda i, k, s: (0, 0), **resident),   # b1
                pl.BlockSpec((n_pad, n_pad), lambda i, k, s: (0, 0), **resident),  # W2
                pl.BlockSpec((1, n_pad), lambda i, k, s: (0, 0), **resident),   # b2
            ],
            out_specs=pl.BlockSpec((tb, n_pad), lambda i, k, s: (i, 0)),
            scratch_shapes=([pltpu.VMEM((tb, n_pad), jnp.float32)]
                            if num_k > 1 else []),
        ),
        compiler_params=pltpu.CompilerParams(
            # Stateless PRNG -> batch tiles are independent ("parallel" lets
            # Mosaic shard across TCs); K is the reduction axis -> "arbitrary".
            dimension_semantics=("parallel", "arbitrary"),
            vmem_limit_bytes=int(vmem_limit),
        ),
        cost_estimate=cost,
    )(seed, x, w1, b1, w2, b2)

    if return_padded or dpad == 0:
        return out
    return out[:, :n_latent]


def _reference_forward(data, params, compute_dtype):
    """Plain-JAX reference of the eval-mode forward (same input rounding)."""
    f32 = jnp.float32
    hp = jax.lax.Precision.HIGHEST
    x = jnp.asarray(data, f32).reshape(-1, params["w1"].shape[0])
    x = x.astype(compute_dtype).astype(f32)
    w1 = params["w1"].astype(compute_dtype).astype(f32)
    w2 = params["w2"].astype(compute_dtype).astype(f32)
    h = jnp.maximum(jnp.dot(x, w1, precision=hp) + params["b1"], 0.0)
    h = h.astype(compute_dtype).astype(f32)
    z = jnp.maximum(jnp.dot(h, w2, precision=hp) + params["b2"], 0.0)
    return z


def init_params(input_size, n_latent, key):
    """Synthetic parameters matching nn.Linear init; stored as (in, out)."""
    k1, k2, k3, k4 = jax.random.split(key, 4)
    bound1 = 1.0 / jnp.sqrt(input_size)
    bound2 = 1.0 / jnp.sqrt(n_latent)
    return {
        "w1": jax.random.uniform(k1, (input_size, n_latent), jnp.float32,
                                 -bound1, bound1),
        "b1": jax.random.uniform(k2, (n_latent,), jnp.float32, -bound1, bound1),
        "w2": jax.random.uniform(k3, (n_latent, n_latent), jnp.float32,
                                 -bound2, bound2),
        "b2": jax.random.uniform(k4, (n_latent,), jnp.float32, -bound2, bound2),
    }


if __name__ == "__main__":
    key = jax.random.PRNGKey(0)
    k_data, k_params, k_data2, k_params2 = jax.random.split(key, 4)

    input_size, n_latent, batch = 32, 32, 8
    data = jax.random.normal(k_data, (batch, input_size), dtype=jnp.float32)
    params = init_params(input_size, n_latent, k_params)

    # 1) exact-semantics f32 path (eval-mode dropout = identity)
    emb_f32 = jax.block_until_ready(
        nonlinear_encoder_forward(data, params, training=False,
                                  compute_dtype=jnp.float32))
    ref_f32 = _reference_forward(data, params, jnp.float32)
    assert emb_f32.shape == (batch, n_latent)
    assert jnp.allclose(emb_f32, ref_f32, atol=1e-2, rtol=1e-2)

    # 2) default fast path: bf16 MXU inputs (cast in-kernel), f32 accumulation
    emb_bf16 = jax.block_until_ready(nonlinear_encoder_forward(data, params))
    ref_bf16 = _reference_forward(data, params, jnp.bfloat16)
    assert emb_bf16.shape == (batch, n_latent)
    assert jnp.allclose(emb_bf16, ref_bf16, atol=3e-2, rtol=3e-2)

    # 3) bf16 output variant (halved writeback / vst pressure)
    emb_b16o = jax.block_until_ready(
        nonlinear_encoder_forward(data, params, out_dtype=jnp.bfloat16))
    assert emb_b16o.dtype == jnp.bfloat16
    assert jnp.allclose(emb_b16o.astype(jnp.float32), ref_bf16,
                        atol=5e-2, rtol=5e-2)

    # 4) training mode (stateless in-kernel splitmix dropout)
    emb_train = jax.block_until_ready(
        nonlinear_encoder_forward(data, params, training=True,
                                  dropout_seed=123))
    assert emb_train.shape == (batch, n_latent)
    assert bool(jnp.all(jnp.isfinite(emb_train)))
    if float(jnp.max(jnp.abs(ref_bf16))) > 0.0:
        assert not jnp.allclose(emb_train, emb_bf16)   # dropout actually fired

    # 5) K-streamed path (forced small k_tile, incl. a ragged last K block)
    input_size2, n_latent2, batch2 = 320, 32, 24
    data2 = jax.random.normal(k_data2, (batch2, input_size2), dtype=jnp.float32)
    params2 = init_params(input_size2, n_latent2, k_params2)
    emb_k = jax.block_until_ready(
        nonlinear_encoder_forward(data2, params2, compute_dtype=jnp.float32,
                                  k_tile=128))
    ref_k = _reference_forward(data2, params2, jnp.float32)
    assert emb_k.shape == (batch2, n_latent2)
    assert jnp.allclose(emb_k, ref_k, atol=2e-2, rtol=2e-2)

    print("KERNEL_OK")
</pallas_src>

<mosaic_0001>
module attributes {stable_mosaic.version = 11 : i64} {
  func.func @_encoder_kernel(%arg0: i32, %arg1: i32, %arg2: memref<1xi32, #tpu.memory_space<smem>>, %arg3: memref<8x32xf32, #tpu.memory_space<vmem>>, %arg4: memref<32x128xf32, #tpu.memory_space<vmem>>, %arg5: memref<1x128xf32, #tpu.memory_space<vmem>>, %arg6: memref<128x128xf32, #tpu.memory_space<vmem>>, %arg7: memref<1x128xf32, #tpu.memory_space<vmem>>, %arg8: memref<8x128xf32, #tpu.memory_space<vmem>>) attributes {dimension_semantics = [#tpu.dimension_semantics<parallel>, #tpu.dimension_semantics<arbitrary>], iteration_bounds = array<i64: 1, 1>, scalar_prefetch = 1 : i64, scratch_operands = 0 : i64, tpu.core_type = #tpu.core_type<tc>, window_params = [{transform_indices = @transform_0, window_bounds = array<i64: 8, 32>}, {pipeline_mode = #tpu.pipeline_mode<synchronous>, transform_indices = @transform_1, window_bounds = array<i64: 32, 128>}, {pipeline_mode = #tpu.pipeline_mode<synchronous>, transform_indices = @transform_2, window_bounds = array<i64: 1, 128>}, {pipeline_mode = #tpu.pipeline_mode<synchronous>, transform_indices = @transform_3, window_bounds = array<i64: 128, 128>}, {pipeline_mode = #tpu.pipeline_mode<synchronous>, transform_indices = @transform_4, window_bounds = array<i64: 1, 128>}, {transform_indices = @transform_5, window_bounds = array<i64: 8, 128>}]} {
    %c0 = arith.constant 0 : index
    %c0_0 = arith.constant 0 : index
    %0 = vector.load %arg3[%c0, %c0_0] : memref<8x32xf32, #tpu.memory_space<vmem>>, vector<8x32xf32>
    %c0_1 = arith.constant 0 : index
    %c0_2 = arith.constant 0 : index
    %1 = vector.load %arg4[%c0_1, %c0_2] : memref<32x128xf32, #tpu.memory_space<vmem>>, vector<32x128xf32>
    %cst = arith.constant dense<0.000000e+00> : vector<8x128xf32>
    %2 = tpu.matmul %0, %1, %cst {dimension_numbers = #tpu.dot_dimension_numbers<[1], [0], [0], [1], [0, 0, 1, 1], [], []>} : vector<8x32xf32>, vector<32x128xf32>, vector<8x128xf32> -> vector<8x128xf32>
    %c0_3 = arith.constant 0 : index
    %c0_4 = arith.constant 0 : index
    %3 = vector.load %arg5[%c0_3, %c0_4] : memref<1x128xf32, #tpu.memory_space<vmem>>, vector<1x128xf32>
    %4 = vector.broadcast %3 : vector<1x128xf32> to vector<8x128xf32>
    %5 = arith.addf %2, %4 : vector<8x128xf32>
    %cst_5 = arith.constant 0.000000e+00 : f32
    %6 = vector.broadcast %cst_5 : f32 to vector<8x128xf32>
    %7 = arith.maximumf %5, %6 : vector<8x128xf32>
    %c0_6 = arith.constant 0 : index
    %c0_7 = arith.constant 0 : index
    %8 = vector.load %arg6[%c0_6, %c0_7] : memref<128x128xf32, #tpu.memory_space<vmem>>, vector<128x128xf32>
    %cst_8 = arith.constant dense<0.000000e+00> : vector<8x128xf32>
    %9 = tpu.matmul %7, %8, %cst_8 {dimension_numbers = #tpu.dot_dimension_numbers<[1], [0], [0], [1], [0, 0, 1, 1], [], []>} : vector<8x128xf32>, vector<128x128xf32>, vector<8x128xf32> -> vector<8x128xf32>
    %c0_9 = arith.constant 0 : index
    %c0_10 = arith.constant 0 : index
    %10 = vector.load %arg7[%c0_9, %c0_10] : memref<1x128xf32, #tpu.memory_space<vmem>>, vector<1x128xf32>
    %11 = vector.broadcast %10 : vector<1x128xf32> to vector<8x128xf32>
    %12 = arith.addf %9, %11 : vector<8x128xf32>
    %cst_11 = arith.constant 0.000000e+00 : f32
    %13 = vector.broadcast %cst_11 : f32 to vector<8x128xf32>
    %14 = arith.maximumf %12, %13 : vector<8x128xf32>
    %c0_12 = arith.constant 0 : index
    %c0_13 = arith.constant 0 : index
    %15 = vector.load %arg8[%c0_12, %c0_13] : memref<8x128xf32, #tpu.memory_space<vmem>>, vector<8x128xf32>
    tpu.vector_store %arg8[%c0_12, %c0_13], %14 {strides = array<i32>} : memref<8x128xf32, #tpu.memory_space<vmem>>, vector<8x128xf32>,
    return
  }
  func.func @transform_0(%arg0: i32, %arg1: i32, %arg2: memref<1xi32, #tpu.memory_space<smem>>) -> (i32, i32) {
    %c0_i32 = arith.constant 0 : i32
    return %arg0, %arg1 : i32, i32
  }
  func.func @transform_1(%arg0: i32, %arg1: i32, %arg2: memref<1xi32, #tpu.memory_space<smem>>) -> (i32, i32) {
    %c0_i32 = arith.constant 0 : i32
    %c0_i32_0 = arith.constant 0 : i32
    return %arg1, %c0_i32 : i32, i32
  }
  func.func @transform_2(%arg0: i32, %arg1: i32, %arg2: memref<1xi32, #tpu.memory_space<smem>>) -> (i32, i32) {
    %c0_i32 = arith.constant 0 : i32
    %c0_i32_0 = arith.constant 0 : i32
    %c0_i32_1 = arith.constant 0 : i32
    return %c0_i32, %c0_i32_0 : i32, i32
  }
  func.func @transform_3(%arg0: i32, %arg1: i32, %arg2: memref<1xi32, #tpu.memory_space<smem>>) -> (i32, i32) {
    %c0_i32 = arith.constant 0 : i32
    %c0_i32_0 = arith.constant 0 : i32
    %c0_i32_1 = arith.constant 0 : i32
    return %c0_i32, %c0_i32_0 : i32, i32
  }
  func.func @transform_4(%arg0: i32, %arg1: i32, %arg2: memref<1xi32, #tpu.memory_space<smem>>) -> (i32, i32) {
    %c0_i32 = arith.constant 0 : i32
    %c0_i32_0 = arith.constant 0 : i32
    %c0_i32_1 = arith.constant 0 : i32
    return %c0_i32, %c0_i32_0 : i32, i32
  }
  func.func @transform_5(%arg0: i32, %arg1: i32, %arg2: memref<1xi32, #tpu.memory_space<smem>>) -> (i32, i32) {
    %c0_i32 = arith.constant 0 : i32
    %c0_i32_0 = arith.constant 0 : i32
    return %arg0, %c0_i32 : i32, i32
  }
}

</mosaic_0001>

<bundles_post_ra>
// kernel: tpu_custom_call.1
= control target key start
LH: loop header
LB: loop body
LE: loop exit
PB: predicated region body
PF: predicated region fallthrough
CT: control target
= control target key end

     0   :  { %12 = vsyncpa [#allocation5], 0  ;;  %s508_s0 = inlined_call_operand.<no memory space> [shape: s32[1], index: 0, kind: input, shape index: {}]   ;;  %s509_s1 = inlined_call_operand.hbm [shape: f32[8,32], index: 1, kind: input, shape index: {}]   ;;  %s510_s2 = inlined_call_operand.hbm [shape: f32[32,128], index: 2, kind: input, shape index: {}]   ;;  %s511_s3 = inlined_call_operand.vmem [shape: f32[1,128], index: 3, kind: input, shape index: {}]   ;;  %s512_s4 = inlined_call_operand.hbm [shape: f32[128,128], index: 4, kind: input, shape index: {}]   ;;  %s513_s5 = inlined_call_operand.vmem [shape: f32[1,128], index: 5, kind: input, shape index: {}]   ;;  %s514_s6 = inlined_call_operand.hbm [shape: f32[8,128], index: 6, kind: output, shape index: {}]  }
   0x1   :  { %13 = vsyncpa [#allocation8], 0 }
   0x2   :  { %14 = vsyncpa [#allocation6], 0  ;;  %s425_s0 = smov [#allocation7]  }
   0x3   :  { %s30_s21 = sshll.u32 %s425_s0, 4  ;;  %s31_s21 = int_to_ptr.vmem [resolvable:$true] %s30_s21 }
   0x4   :  { %s347_s22 = scalar_lea.vmem %s31_s21, 512  ;;  %p352_p1 = scmp.lt.s32.totalorder %s31_s21, %s31_s21 }
   0x5   :  { %p348_p0 = scmp.ne.s32.totalorder %s31_s21, %s347_s22  ;;  %p353_p2 = scmp.lt.s32.totalorder %s347_s22, %s347_s22 }
   0x7   :  { %p354_p3 = por %p353_p2, %p352_p1 }
   0x9   :  { %p355_p4 = pnand %p354_p3, %p348_p0 }
   0xb   :  { %358 = shalt.err (!%p355_p4)
}
   0xc   :  { %s426_s23 = smov 128   ;;  %s427_s24 = smov 8  }
   0xd   :  { %36 = dma.hbm_to_vmem [thread:$0]  %s510_s2, 512, %s31_s21, [#allocation8], %s426_s23, %s426_s23, %s427_s24  }
   0xe   :  { %s428_s27 = smov [#allocation4]   ;;  %s429_s29 = smov [#allocation9]  }
   0xf   :  { %s21_s28 = sshll.u32 %s428_s27, 4  ;;  %s44_s30 = sshll.u32 %s429_s29, 4  ;;  %s22_s28 = int_to_ptr.vmem [resolvable:$true] %s21_s28  ;;  %s45_s30 = int_to_ptr.vmem [resolvable:$true] %s44_s30 }
  0x10   :  { %s367_s7 = scalar_lea.vmem %s22_s28, 128  ;;  %p372_p6 = scmp.lt.s32.totalorder %s22_s28, %s22_s28 }
  0x11   :  { %p368_p5 = scmp.ne.s32.totalorder %s22_s28, %s367_s7  ;;  %p373_p7 = scmp.lt.s32.totalorder %s367_s7, %s367_s7 }
  0x13   :  { %p374_p8 = por %p373_p7, %p372_p6 }
  0x15   :  { %p375_p9 = pnand %p374_p8, %p368_p5 }
  0x17   :  { %378 = shalt.err (!%p375_p9)
}
  0x18   :  { %24 = dma.hbm_to_vmem [thread:$0]  %s509_s1, 128, %s22_s28, [#allocation5]  }
  0x19   :  { %s387_s10 = scalar_lea.vmem %s45_s30, 2048  ;;  %p392_p11 = scmp.lt.s32.totalorder %s45_s30, %s45_s30 }
  0x1a   :  { %p388_p10 = scmp.ne.s32.totalorder %s45_s30, %s387_s10  ;;  %p393_p12 = scmp.lt.s32.totalorder %s387_s10, %s387_s10 }
  0x1c   :  { %p394_p13 = por %p393_p12, %p392_p11 }
  0x1e   :  { %p395_p0 = pnand %p394_p13, %p388_p10 }
  0x20   :  { %398 = shalt.err (!%p395_p0)
}
  0x21   :  { %50 = dma.hbm_to_vmem [thread:$0]  %s512_s4, 2048, %s45_s30, [#allocation8], %s426_s23, %s426_s23, %s427_s24  }
  0x22   :  { %419 = dma.done.wait [#allocation5], 128  }
  0x23   :  { %420 = vsyncadd [#allocation5], 4294967168 }
  0x24   :  { %421 = dma.done.wait [#allocation8], 2560  }
  0x25   :  { %422 = vsyncadd [#allocation8], 4294964736  ;;  %v430_v0 = vmov 0.0   ;;  %vm431_vm0 = vmmov 0   ;;  %v66_v1 = vld [vmem:[#allocation7 + $0x18] sm:$0xff]  ;;  %v65_v2 = vld [vmem:[#allocation7 + $0x10] sm:$0xff] }
  0x26   :  { %285 = vmatprep.subr.mxu0 %v430_v0  ;;  %293 = vmatprep.mubr.msk.f32.mxu0 %vm431_vm0, %v430_v0  ;;  %v164_v3 = vld [vmem:[#allocation9 + $0x78] sm:$0xff]  ;;  %v64_v4 = vld [vmem:[#allocation7 + $0x8] sm:$0xff]  ;;  %v163_v5 = vld [vmem:[#allocation9 + $0x70] sm:$0xff]  ;;  %vm74_vm1 = vcmask 261120   ;;  %s432_s14 = smov [#allocation10]  }
  0x27   :  { %296 = vmatprep.subr.mxu1 %v430_v0  ;;  %328 = vmatprep.mubr.msk.f32.mxu1 %vm431_vm0, %v430_v0  ;;  %v162_v6 = vld [vmem:[#allocation9 + $0x68] sm:$0xff]  ;;  %v63_v7 = vld [vmem:[#allocation7] sm:$0xff]  ;;  %v62_v8 = vld [vmem:[#allocation4] sm:$0xff]  ;;  %s250_s15 = sshll.u32 %s432_s14, 4  ;;  %s251_s15 = int_to_ptr.vmem [resolvable:$true] %s250_s15 }
  0x28   :  { %286 = vmatpush3.msra.mxu0 %v66_v1  ;;  %297 = vmatpush3.msra.mxu1 %v164_v3  ;;  %v161_v9 = vld [vmem:[#allocation9 + $0x60] sm:$0xff]  ;;  %v160_v10 = vld [vmem:[#allocation9 + $0x58] sm:$0xff]  ;;  %v159_v11 = vld [vmem:[#allocation9 + $0x50] sm:$0xff]  ;;  %s399_s16 = scalar_lea.vmem %s251_s15, 128  ;;  %p404_p2 = scmp.lt.s32.totalorder %s251_s15, %s251_s15 }
  0x29   :  { %287 = vmatprep.subr.mxu0 %v430_v0  ;;  %298 = vmatprep.subr.mxu1 %v430_v0  ;;  %v158_v12 = vld [vmem:[#allocation9 + $0x48] sm:$0xff]  ;;  %v157_v13 = vld [vmem:[#allocation9 + $0x40] sm:$0xff]  ;;  %v156_v14 = vld [vmem:[#allocation9 + $0x38] sm:$0xff]  ;;  %p400_p1 = scmp.ne.s32.totalorder %s251_s15, %s399_s16  ;;  %p405_p3 = scmp.lt.s32.totalorder %s399_s16, %s399_s16 }
  0x2a   :  { %288 = vmatpush3.msra.mxu0 %v65_v2  ;;  %299 = vmatpush3.msra.mxu1 %v163_v5  ;;  %v155_v15 = vld [vmem:[#allocation9 + $0x30] sm:$0xff]  ;;  %v154_v16 = vld [vmem:[#allocation9 + $0x28] sm:$0xff]  ;;  %v153_v17 = vld [vmem:[#allocation9 + $0x20] sm:$0xff] }
  0x2b   :  { %289 = vmatprep.subr.mxu0 %v430_v0  ;;  %300 = vmatprep.subr.mxu1 %v430_v0  ;;  %v152_v18 = vld [vmem:[#allocation9 + $0x18] sm:$0xff]  ;;  %v151_v19 = vld [vmem:[#allocation9 + $0x10] sm:$0xff]  ;;  %v150_v20 = vld [vmem:[#allocation9 + $0x8] sm:$0xff]  ;;  %p406_p4 = por %p405_p3, %p404_p2 }
  0x2c   :  { %290 = vmatpush3.msra.mxu0 %v64_v4  ;;  %301 = vmatpush3.msra.mxu1 %v162_v6  ;;  %v149_v21 = vld [vmem:[#allocation9] sm:$0xff]  ;;  %v260_v22 = vld [vmem:[%s511_s3] ss:$0 sm:$0xff] }
  0x2d   :  { %291 = vmatprep.subr.mxu0 %v430_v0  ;;  %302 = vmatprep.subr.mxu1 %v430_v0  ;;  %v262_v27 = vld [vmem:[%s513_s5] ss:$0 sm:$0xff]  ;;  %p407_p5 = pnand %p406_p4, %p400_p1 }
  0x2e   :  { %292 = vmatpush3.msra.mxu0 %v63_v7  ;;  %303 = vmatpush3.msra.mxu1 %v161_v9 }
  0x2f   :  { %294 = vmatmul.mubr.msk.f32.vlgmr.msra.gmra.mxu0 %vm74_vm1, %v62_v8  ;;  %304 = vmatprep.subr.mxu1 %v430_v0 }
  0x30   :  { %305 = vmatpush3.msra.mxu1 %v160_v10 }
  0x31   :  { %306 = vmatprep.subr.mxu1 %v430_v0 }
  0x32   :  { %307 = vmatpush3.msra.mxu1 %v159_v11 }
  0x33   :  { %308 = vmatprep.subr.mxu1 %v430_v0 }
  0x34   :  { %309 = vmatpush3.msra.mxu1 %v158_v12 }
  0x35   :  { %310 = vmatprep.subr.mxu1 %v430_v0 }
  0x36   :  { %311 = vmatpush3.msra.mxu1 %v157_v13 }
  0x37   :  { %312 = vmatprep.subr.mxu1 %v430_v0 }
  0x38   :  { %313 = vmatpush3.msra.mxu1 %v156_v14 }
  0x39   :  { %314 = vmatprep.subr.mxu1 %v430_v0 }
  0x3a   :  { %315 = vmatpush3.msra.mxu1 %v155_v15 }
  0x3b   :  { %316 = vmatprep.subr.mxu1 %v430_v0 }
  0x3c   :  { %317 = vmatpush3.msra.mxu1 %v154_v16 }
  0x3d   :  { %318 = vmatprep.subr.mxu1 %v430_v0 }
  0x3e   :  { %319 = vmatpush3.msra.mxu1 %v153_v17 }
  0x3f   :  { %320 = vmatprep.subr.mxu1 %v430_v0 }
  0x40   :  { %321 = vmatpush3.msra.mxu1 %v152_v18 }
  0x41   :  { %322 = vmatprep.subr.mxu1 %v430_v0 }
  0x42   :  { %323 = vmatpush3.msra.mxu1 %v151_v19 }
  0x43   :  { %324 = vmatprep.subr.mxu1 %v430_v0 }
  0x44   :  { %325 = vmatpush3.msra.mxu1 %v150_v20 }
  0x45   :  { %326 = vmatprep.subr.mxu1 %v430_v0 }
  0x46   :  { %327 = vmatpush3.msra.mxu1 %v149_v21 }
  0xef   :  { %v144_v23 = vpop.f32.mrf.mxu0 }
  0xf0   :  { %v145_v24 = vadd.f32 %v260_v22, %v144_v23 }
  0xf1   :  { %v295_v25 = vpop.f32.mrf.mxu0 }
  0xf2   :  { %v148_v26 = vmax.f32 %v145_v24, 0.0 }
  0xf4   :  { %329 = vmatmul.mubr.f32.vlgmr.msra.gmra.mxu1 %v148_v26 }
 0x1b4   :  { %v238_v28 = vpop.f32.mrf.mxu1 }
 0x1b5   :  { %v239_v29 = vadd.f32 %v262_v27, %v238_v28 }
 0x1b6   :  { %v330_v30 = vpop.f32.mrf.mxu1 }
 0x1b7   :  { %v242_v31 = vmax.f32 %v239_v29, 0.0 }
 0x1b9   :  { %243 = vst [vmem:[#allocation10] sm:$0xff] %v242_v31 }
 0x1ba   :  { %410 = shalt.err (!%p407_p5)
}
 0x1bb   :  { %253 = dma.vmem_to_hbm [thread:$0]  %s251_s15, 128, %s514_s6, [#allocation6]  }
 0x1bc   :  { %423 = dma.done.wait [#allocation6], 128  }
 0x1bd   :  { %424 = vsyncadd [#allocation6], 4294967168 }
 0x1be   :  { %257 = vsyncpa [#allocation5], 1 }
 0x1bf   :  { %258 = vsyncpa [#allocation8], 1 }
 0x1c0   :  { %259 = vsyncpa [#allocation6], 1 }

</bundles_post_ra>
